<compile_context>
chip_gen: v5e
topology: v5e:2x2
jax: 0.10.0
libtpu: 0.0.40
codegen_flags: <defaults>
</compile_context>

<pallas_src>
import jax
import jax.numpy as jnp
from jax.experimental import pallas as pl
from jax.experimental.pallas import tpu as pltpu  # noqa: F401  (TPU backend)


def _convt1x1_silu_crop_kernel(x_ref, wb_ref, o_ref):
    # x_ref:  (Cin, H, W)       full input image, channel-major
    # wb_ref: (Cout, Cin + 1)   weight in columns 0..Cin-1, bias in column Cin
    # o_ref:  (Cout, H-2, W-2)  cropped output (ConvTranspose2d padding=1)
    cout, hc, wc = o_ref.shape
    cin = x_ref.shape[0]
    del cout  # static, unused beyond shape

    wb = wb_ref[...]

    # padding=1 of a stride-1 transposed 1x1 conv only depends on the interior
    # pixels, so load exactly those (fuses the crop into the kernel).
    x = x_ref[:, pl.ds(1, hc), pl.ds(1, wc)]                  # (Cin, Hc, Wc)

    # Channel mix as Cin broadcast multiply-accumulates on the VPU:
    #   acc[o, h, w] = sum_i wb[o, i] * x[i, h, w]
    acc = wb[:, 0:1, None] * x[0:1, :, :]                     # (Cout, Hc, Wc)
    for i in range(1, cin):
        acc = acc + wb[:, i:i + 1, None] * x[i:i + 1, :, :]
    v1 = acc + wb[:, cin:cin + 1, None]                       # + bias[o]

    # SiLU: v1 * sigmoid(v1) = t + t*tanh(t) with t = v1/2  (tanh on the EUP).
    t = 0.5 * v1
    o_ref[...] = (t + t * jnp.tanh(t)).astype(o_ref.dtype)


def model_forward(x_nchw, weight, bias):
    """x_nchw: (N, Cin, H, W) float32
       weight: (Cin, Cout, 1, 1) float32   (ConvTranspose2d weight layout)
       bias:   (Cout,) float32
       returns (N, Cout, H-2, W-2) float32"""
    N, Cin, H, W = x_nchw.shape
    Cout = weight.shape[1]
    pad = 1
    Hc, Wc = H - 2 * pad, W - 2 * pad

    # The module fixes N == 1, so squeezing the batch dim is a free reshape.
    # TODO(synk): for N > 1 add a grid over the batch axis with per-image
    # (Cin, H, W) blocks instead of flattening batches together.
    x3 = x_nchw.reshape(Cin, H, W)

    # Merge weight and bias into a single (Cout, Cin+1) VMEM input.
    w_t = jnp.transpose(weight[:, :, 0, 0])                   # (Cout, Cin)
    wb = jnp.concatenate([w_t, bias.reshape(Cout, 1)], axis=1)

    out = pl.pallas_call(
        _convt1x1_silu_crop_kernel,
        out_shape=jax.ShapeDtypeStruct((Cout, Hc, Wc), jnp.float32),
        # Single-block, gridless: total footprint ~48 KiB, entirely launch/DMA
        # bound on v5e/v6e/v7x; a grid would only add per-step overhead.
        in_specs=[
            pl.BlockSpec((Cin, H, W), lambda: (0, 0, 0)),
            pl.BlockSpec((Cout, Cin + 1), lambda: (0, 0)),
        ],
        out_specs=pl.BlockSpec((Cout, Hc, Wc), lambda: (0, 0, 0)),
    )(x3, wb)

    return out.reshape(N, Cout, Hc, Wc)


if __name__ == "__main__":
    key = jax.random.PRNGKey(0)
    kx, kw, kb = jax.random.split(key, 3)

    # Shapes implied by the module: x1 = randn(1, 8, 8, 64) in NCHW,
    # ConvTranspose2d(8, 8, kernel_size=1, stride=1, padding=1)
    N, Cin, H, W = 1, 8, 8, 64
    Cout = 8

    x1 = jax.random.normal(kx, (N, Cin, H, W), dtype=jnp.float32)
    # deterministic parameter init (ConvTranspose2d weight layout: (Cin, Cout, 1, 1))
    weight = 0.1 * jax.random.normal(kw, (Cin, Cout, 1, 1), dtype=jnp.float32)
    bias = 0.1 * jax.random.normal(kb, (Cout,), dtype=jnp.float32)

    out = model_forward(x1, weight, bias)
    out = jax.block_until_ready(out)
    assert out.shape == (N, Cout, H - 2, W - 2), out.shape

    # reference check in plain JAX (same math, no Pallas)
    x_crop = x1[:, :, 1:H - 1, 1:W - 1]
    v1_ref = jnp.einsum('nihw,io->nohw', x_crop, weight[:, :, 0, 0]) + bias[None, :, None, None]
    ref = v1_ref * jax.nn.sigmoid(v1_ref)
    assert jnp.allclose(out, ref, atol=1e-5, rtol=1e-5), float(jnp.max(jnp.abs(out - ref)))

    print("KERNEL_OK")
</pallas_src>

<mosaic_0001>
module attributes {stable_mosaic.version = 11 : i64} {
  func.func @_convt1x1_silu_crop_kernel(%arg0: memref<8x8x64xf32, #tpu.memory_space<vmem>>, %arg1: memref<8x9xf32, #tpu.memory_space<vmem>>, %arg2: memref<8x6x62xf32, #tpu.memory_space<vmem>>) attributes {dimension_semantics = [], scalar_prefetch = 0 : i64, scratch_operands = 0 : i64, tpu.core_type = #tpu.core_type<tc>} {
    %c0 = arith.constant 0 : index
    %c0_0 = arith.constant 0 : index
    %0 = vector.load %arg1[%c0, %c0_0] : memref<8x9xf32, #tpu.memory_space<vmem>>, vector<8x9xf32>
    %c0_1 = arith.constant 0 : index
    %c1 = arith.constant 1 : index
    %c1_2 = arith.constant 1 : index
    %1 = vector.load %arg0[%c0_1, %c1, %c1_2] : memref<8x8x64xf32, #tpu.memory_space<vmem>>, vector<8x6x62xf32>
    %2 = vector.extract_strided_slice %0 {offsets = [0, 0], sizes = [8, 1], strides = [1, 1]} : vector<8x9xf32> to vector<8x1xf32>
    %3 = vector.shape_cast %2 : vector<8x1xf32> to vector<8x1x1xf32>
    %4 = vector.extract_strided_slice %1 {offsets = [0, 0, 0], sizes = [1, 6, 62], strides = [1, 1, 1]} : vector<8x6x62xf32> to vector<1x6x62xf32>
    %5 = vector.broadcast %3 : vector<8x1x1xf32> to vector<8x6x62xf32>
    %6 = vector.broadcast %4 : vector<1x6x62xf32> to vector<8x6x62xf32>
    %7 = arith.mulf %5, %6 : vector<8x6x62xf32>
    %8 = vector.extract_strided_slice %0 {offsets = [0, 1], sizes = [8, 1], strides = [1, 1]} : vector<8x9xf32> to vector<8x1xf32>
    %9 = vector.shape_cast %8 : vector<8x1xf32> to vector<8x1x1xf32>
    %10 = vector.extract_strided_slice %1 {offsets = [1, 0, 0], sizes = [1, 6, 62], strides = [1, 1, 1]} : vector<8x6x62xf32> to vector<1x6x62xf32>
    %11 = vector.broadcast %9 : vector<8x1x1xf32> to vector<8x6x62xf32>
    %12 = vector.broadcast %10 : vector<1x6x62xf32> to vector<8x6x62xf32>
    %13 = arith.mulf %11, %12 : vector<8x6x62xf32>
    %14 = arith.addf %7, %13 : vector<8x6x62xf32>
    %15 = vector.extract_strided_slice %0 {offsets = [0, 2], sizes = [8, 1], strides = [1, 1]} : vector<8x9xf32> to vector<8x1xf32>
    %16 = vector.shape_cast %15 : vector<8x1xf32> to vector<8x1x1xf32>
    %17 = vector.extract_strided_slice %1 {offsets = [2, 0, 0], sizes = [1, 6, 62], strides = [1, 1, 1]} : vector<8x6x62xf32> to vector<1x6x62xf32>
    %18 = vector.broadcast %16 : vector<8x1x1xf32> to vector<8x6x62xf32>
    %19 = vector.broadcast %17 : vector<1x6x62xf32> to vector<8x6x62xf32>
    %20 = arith.mulf %18, %19 : vector<8x6x62xf32>
    %21 = arith.addf %14, %20 : vector<8x6x62xf32>
    %22 = vector.extract_strided_slice %0 {offsets = [0, 3], sizes = [8, 1], strides = [1, 1]} : vector<8x9xf32> to vector<8x1xf32>
    %23 = vector.shape_cast %22 : vector<8x1xf32> to vector<8x1x1xf32>
    %24 = vector.extract_strided_slice %1 {offsets = [3, 0, 0], sizes = [1, 6, 62], strides = [1, 1, 1]} : vector<8x6x62xf32> to vector<1x6x62xf32>
    %25 = vector.broadcast %23 : vector<8x1x1xf32> to vector<8x6x62xf32>
    %26 = vector.broadcast %24 : vector<1x6x62xf32> to vector<8x6x62xf32>
    %27 = arith.mulf %25, %26 : vector<8x6x62xf32>
    %28 = arith.addf %21, %27 : vector<8x6x62xf32>
    %29 = vector.extract_strided_slice %0 {offsets = [0, 4], sizes = [8, 1], strides = [1, 1]} : vector<8x9xf32> to vector<8x1xf32>
    %30 = vector.shape_cast %29 : vector<8x1xf32> to vector<8x1x1xf32>
    %31 = vector.extract_strided_slice %1 {offsets = [4, 0, 0], sizes = [1, 6, 62], strides = [1, 1, 1]} : vector<8x6x62xf32> to vector<1x6x62xf32>
    %32 = vector.broadcast %30 : vector<8x1x1xf32> to vector<8x6x62xf32>
    %33 = vector.broadcast %31 : vector<1x6x62xf32> to vector<8x6x62xf32>
    %34 = arith.mulf %32, %33 : vector<8x6x62xf32>
    %35 = arith.addf %28, %34 : vector<8x6x62xf32>
    %36 = vector.extract_strided_slice %0 {offsets = [0, 5], sizes = [8, 1], strides = [1, 1]} : vector<8x9xf32> to vector<8x1xf32>
    %37 = vector.shape_cast %36 : vector<8x1xf32> to vector<8x1x1xf32>
    %38 = vector.extract_strided_slice %1 {offsets = [5, 0, 0], sizes = [1, 6, 62], strides = [1, 1, 1]} : vector<8x6x62xf32> to vector<1x6x62xf32>
    %39 = vector.broadcast %37 : vector<8x1x1xf32> to vector<8x6x62xf32>
    %40 = vector.broadcast %38 : vector<1x6x62xf32> to vector<8x6x62xf32>
    %41 = arith.mulf %39, %40 : vector<8x6x62xf32>
    %42 = arith.addf %35, %41 : vector<8x6x62xf32>
    %43 = vector.extract_strided_slice %0 {offsets = [0, 6], sizes = [8, 1], strides = [1, 1]} : vector<8x9xf32> to vector<8x1xf32>
    %44 = vector.shape_cast %43 : vector<8x1xf32> to vector<8x1x1xf32>
    %45 = vector.extract_strided_slice %1 {offsets = [6, 0, 0], sizes = [1, 6, 62], strides = [1, 1, 1]} : vector<8x6x62xf32> to vector<1x6x62xf32>
    %46 = vector.broadcast %44 : vector<8x1x1xf32> to vector<8x6x62xf32>
    %47 = vector.broadcast %45 : vector<1x6x62xf32> to vector<8x6x62xf32>
    %48 = arith.mulf %46, %47 : vector<8x6x62xf32>
    %49 = arith.addf %42, %48 : vector<8x6x62xf32>
    %50 = vector.extract_strided_slice %0 {offsets = [0, 7], sizes = [8, 1], strides = [1, 1]} : vector<8x9xf32> to vector<8x1xf32>
    %51 = vector.shape_cast %50 : vector<8x1xf32> to vector<8x1x1xf32>
    %52 = vector.extract_strided_slice %1 {offsets = [7, 0, 0], sizes = [1, 6, 62], strides = [1, 1, 1]} : vector<8x6x62xf32> to vector<1x6x62xf32>
    %53 = vector.broadcast %51 : vector<8x1x1xf32> to vector<8x6x62xf32>
    %54 = vector.broadcast %52 : vector<1x6x62xf32> to vector<8x6x62xf32>
    %55 = arith.mulf %53, %54 : vector<8x6x62xf32>
    %56 = arith.addf %49, %55 : vector<8x6x62xf32>
    %57 = vector.extract_strided_slice %0 {offsets = [0, 8], sizes = [8, 1], strides = [1, 1]} : vector<8x9xf32> to vector<8x1xf32>
    %58 = vector.shape_cast %57 : vector<8x1xf32> to vector<8x1x1xf32>
    %59 = vector.broadcast %58 : vector<8x1x1xf32> to vector<8x6x62xf32>
    %60 = arith.addf %56, %59 : vector<8x6x62xf32>
    %cst = arith.constant 5.000000e-01 : f32
    %61 = vector.broadcast %cst : f32 to vector<8x6x62xf32>
    %62 = arith.mulf %61, %60 : vector<8x6x62xf32>
    %63 = math.tanh %62 : vector<8x6x62xf32>
    %64 = arith.mulf %62, %63 : vector<8x6x62xf32>
    %65 = arith.addf %62, %64 : vector<8x6x62xf32>
    %c0_3 = arith.constant 0 : index
    %c0_4 = arith.constant 0 : index
    %c0_5 = arith.constant 0 : index
    %66 = vector.load %arg2[%c0_3, %c0_4, %c0_5] : memref<8x6x62xf32, #tpu.memory_space<vmem>>, vector<8x6x62xf32>
    tpu.vector_store %arg2[%c0_3, %c0_4, %c0_5], %65 {strides = array<i32>} : memref<8x6x62xf32, #tpu.memory_space<vmem>>, vector<8x6x62xf32>,
    return
  }
}

</mosaic_0001>

<bundles_post_ra>
// kernel: tpu_custom_call.1
= control target key start
LH: loop header
LB: loop body
LE: loop exit
PB: predicated region body
PF: predicated region fallthrough
CT: control target
= control target key end

     0   :  { %7 = vsyncpa [#allocation3], 0  ;;  %s933_s0 = inlined_call_operand.hbm [shape: f32[8,8,64], index: 0, kind: input, shape index: {}]   ;;  %s934_s1 = inlined_call_operand.hbm [shape: f32[8,9], index: 1, kind: input, shape index: {}]   ;;  %s935_s2 = inlined_call_operand.vmem [shape: f32[8,6,62], index: 2, kind: output, shape index: {}]  }
   0x1   :  { %s13_s11 = sshll.u32 %s933_s0, 4  ;;  %s14_s11 = int_to_ptr.hbm [resolvable:$true] %s13_s11 }
   0x2   :  { %8 = vsyncpa [#allocation5], 0  ;;  %s670_s12 = smov [#allocation2]   ;;  %s27_s16 = sshll.u32 %s934_s1, 4  ;;  %s28_s16 = int_to_ptr.hbm [resolvable:$true] %s27_s16 }
   0x3   :  { %s15_s13 = sshll.u32 %s670_s12, 4  ;;  %s671_s17 = smov 128   ;;  %s16_s13 = int_to_ptr.vmem [resolvable:$true] %s15_s13 }
   0x4   :  { %s672_s18 = smov 8   ;;  %s673_s19 = smov [#allocation4]  }
   0x5   :  { %21 = dma.hbm_to_vmem [thread:$0]  %s14_s11, 1024, %s16_s13, [#allocation3], %s671_s17, %s671_s17, %s672_s18  }
   0x6   :  { %s29_s20 = sshll.u32 %s673_s19, 4  ;;  %s30_s20 = int_to_ptr.vmem [resolvable:$true] %s29_s20 }
   0x7   :  { %32 = dma.hbm_to_vmem [thread:$0]  %s28_s16, 128, %s30_s20, [#allocation5]  }
   0x8   :  { %666 = dma.done.wait [#allocation3], 1024  }
   0x9   :  { %667 = vsyncadd [#allocation3], 4294966272 }
   0xa   :  { %668 = dma.done.wait [#allocation5], 128  }
   0xb   :  { %669 = vsyncadd [#allocation5], 4294967168  ;;  %v674_v0 = vmov 0   ;;  %v41_v1 = vld [vmem:[#allocation4] sm:$0xff]  ;;  %v675_v17 = vmov 1   ;;  %v676_v18 = vmov 2  }
   0xc   :  { %575 = vset.pattern.permute.xlu0 %v674_v0  ;;  %577 = vset.pattern.permute.xlu2 %v674_v0  ;;  %v705_v2 = vperm.slane %v41_v1, 0  ;;  %v54_v3 = vrot.slane %v41_v1, 4  ;;  %v52_v4 = vrot.slane %v41_v1, 2  ;;  %v51_v7 = vrot.slane %v41_v1, 1  ;;  %v754_v22 = vld [vmem:[#allocation2 + $0x1] sm:$0x3f] }
   0xd   :  { %576 = vset.pattern.permute.xlu1 %v674_v0  ;;  %v55_v8 = vrot.slane %v41_v1, 5  ;;  %v53_v9 = vrot.slane %v41_v1, 3  ;;  %v56_v13 = vrot.slane %v41_v1, 6  ;;  %v57_v14 = vrot.slane %v41_v1, 7  ;;  %v770_v29 = vld [vmem:[#allocation2 + $0x9] sm:$0x3f] }
   0xe   :  { %67 = vperm.xlu0 %575, %v705_v2   ;;  %v708_v5 = vperm.slane %v54_v3, 0  ;;  %v710_v6 = vperm.slane %v52_v4, 0  ;;  %v714_v10 = vperm.slane %v51_v7, 0  ;;  %v677_v19 = vmov 3   ;;  %v784_v47 = vld [vmem:[#allocation2 + $0x11] sm:$0x3f] }
   0xf   :  { %v716_v11 = vperm.slane %v55_v8, 0  ;;  %v718_v12 = vperm.slane %v53_v9, 0  ;;  %v723_v15 = vperm.slane %v56_v13, 0  ;;  %v725_v16 = vperm.slane %v57_v14, 0  ;;  %s683_s0 = smov 127  }
  0x10   :  { %83 = vperm.xlu2 %577, %v708_v5   ;;  %75 = vperm.xlu1 %576, %v710_v6   ;;  %v678_v20 = vmov 4   ;;  %v679_v21 = vmov 5   ;;  %v680_v28 = vmov 6   ;;  %v681_v43 = vmov 7  }
  0x11   :  { %v682_v63 = vmov 8   ;;  %vm546_vm0 = vcmask 504832  }
  0x16   :  { %71 = vperm.xlu0 %575, %v714_v10  }
  0x18   :  { %87 = vperm.xlu2 %577, %v716_v11   ;;  %79 = vperm.xlu1 %576, %v718_v12  }
  0x1e   :  { %91 = vperm.xlu0 %575, %v723_v15  }
  0x20   :  { %578 = vset.pattern.permute.xlu2 %v675_v17  ;;  %95 = vperm.xlu1 %576, %v725_v16  }
  0x21   :  { %107 = vperm.xlu2 %578, %v705_v2  }
  0x26   :  { %579 = vset.pattern.permute.xlu0 %v675_v17 }
  0x27   :  { %111 = vperm.xlu0 %579, %v714_v10  }
  0x28   :  { %580 = vset.pattern.permute.xlu1 %v675_v17 }
  0x29   :  { %119 = vperm.xlu2 %578, %v718_v12   ;;  %115 = vperm.xlu1 %580, %v710_v6  }
  0x2f   :  { %131 = vperm.xlu0 %579, %v723_v15  }
  0x31   :  { %127 = vperm.xlu2 %578, %v716_v11   ;;  %123 = vperm.xlu1 %580, %v708_v5  }
  0x37   :  { %582 = vset.pattern.permute.xlu0 %v676_v18 }
  0x38   :  { %159 = vperm.xlu0 %582, %v714_v10  }
  0x39   :  { %581 = vset.pattern.permute.xlu2 %v676_v18  ;;  %135 = vperm.xlu1 %580, %v725_v16  }
  0x3a   :  { %155 = vperm.xlu2 %581, %v705_v2  }
  0x40   :  { %179 = vperm.xlu0 %582, %v723_v15  }
  0x41   :  { %583 = vset.pattern.permute.xlu1 %v676_v18 }
  0x42   :  { %167 = vperm.xlu2 %581, %v718_v12   ;;  %163 = vperm.xlu1 %583, %v710_v6  }
  0x48   :  { %585 = vset.pattern.permute.xlu0 %v677_v19 }
  0x49   :  { %207 = vperm.xlu0 %585, %v714_v10  }
  0x4a   :  { %175 = vperm.xlu2 %581, %v716_v11   ;;  %171 = vperm.xlu1 %583, %v708_v5  }
  0x51   :  { %227 = vperm.xlu0 %585, %v723_v15  }
  0x52   :  { %584 = vset.pattern.permute.xlu2 %v677_v19  ;;  %183 = vperm.xlu1 %583, %v725_v16  }
  0x53   :  { %203 = vperm.xlu2 %584, %v705_v2  }
  0x59   :  { %588 = vset.pattern.permute.xlu0 %v678_v20 }
  0x5a   :  { %586 = vset.pattern.permute.xlu1 %v677_v19  ;;  %255 = vperm.xlu0 %588, %v714_v10  }
  0x5b   :  { %215 = vperm.xlu2 %584, %v718_v12   ;;  %211 = vperm.xlu1 %586, %v710_v6  }
  0x62   :  { %275 = vperm.xlu0 %588, %v723_v15  }
  0x63   :  { %223 = vperm.xlu2 %584, %v716_v11   ;;  %219 = vperm.xlu1 %586, %v708_v5  }
  0x6a   :  { %591 = vset.pattern.permute.xlu0 %v679_v21  ;;  %v84_v23 = vpop.permute.xlu2 %83 }
  0x6b   :  { %v757_v24 = vmul.f32 %v84_v23, %v754_v22  ;;  %587 = vset.pattern.permute.xlu2 %v678_v20  ;;  %231 = vperm.xlu1 %586, %v725_v16  }
  0x6c   :  { %303 = vperm.xlu0 %591, %v714_v10   ;;  %251 = vperm.xlu2 %587, %v705_v2  }
  0x72   :  { %v88_v25 = vpop.permute.xlu2 %87 }
  0x73   :  { %v103_v26 = vmul.f32 %v88_v25, %v754_v22  ;;  %589 = vset.pattern.permute.xlu1 %v678_v20  ;;  %v811_v20 = vld [vmem:[#allocation2 + $0x19] sm:$0x3f] }
  0x74   :  { %323 = vperm.xlu0 %591, %v723_v15   ;;  %263 = vperm.xlu2 %587, %v718_v12  }
  0x75   :  { %259 = vperm.xlu1 %589, %v710_v6  }
  0x7b   :  { %v108_v27 = vpop.permute.xlu2 %107 }
  0x7c   :  { %594 = vset.pattern.permute.xlu0 %v680_v28  ;;  %271 = vperm.xlu2 %587, %v716_v11   ;;  %v138_v30 = vmul.f32 %v108_v27, %v770_v29 }
  0x7d   :  { %267 = vperm.xlu1 %589, %v708_v5   ;;  %351 = vperm.xlu0 %594, %v714_v10  }
  0x80   :  { %v68_v31 = vpop.permute.xlu0 %67 }
  0x81   :  { %v98_v32 = vmul.f32 %v68_v31, %v754_v22 }
  0x82   :  { %v76_v33 = vpop.permute.xlu1 %75 }
  0x83   :  { %v146_v34 = vadd.f32 %v138_v30, %v98_v32  ;;  %v120_v35 = vpop.permute.xlu2 %119  ;;  %v100_v56 = vmul.f32 %v76_v33, %v754_v22 }
  0x84   :  { %590 = vset.pattern.permute.xlu2 %v679_v21  ;;  %v141_v37 = vmul.f32 %v120_v35, %v770_v29 }
  0x85   :  { %279 = vperm.xlu1 %589, %v725_v16   ;;  %371 = vperm.xlu0 %594, %v723_v15  }
  0x86   :  { %299 = vperm.xlu2 %590, %v705_v2  }
  0x88   :  { %v72_v36 = vpop.permute.xlu0 %71 }
  0x89   :  { %v99_v52 = vmul.f32 %v72_v36, %v754_v22 }
  0x8a   :  { %v80_v38 = vpop.permute.xlu1 %79 }
  0x8b   :  { %v101_v39 = vmul.f32 %v80_v38, %v754_v22  ;;  %v128_v40 = vpop.permute.xlu2 %127 }
  0x8c   :  { %v143_v41 = vmul.f32 %v128_v40, %v770_v29 }
  0x8d   :  { %v149_v42 = vadd.f32 %v141_v37, %v101_v39  ;;  %592 = vset.pattern.permute.xlu1 %v679_v21  ;;  %597 = vset.pattern.permute.xlu0 %v681_v43 }
  0x8e   :  { %v151_v44 = vadd.f32 %v143_v41, %v103_v26  ;;  %311 = vperm.xlu2 %590, %v718_v12   ;;  %307 = vperm.xlu1 %592, %v710_v6  }
  0x8f   :  { %399 = vperm.xlu0 %597, %v714_v10  }
  0x90   :  { %v92_v45 = vpop.permute.xlu0 %91 }
  0x91   :  { %v104_v0 = vmul.f32 %v92_v45, %v754_v22 }
  0x92   :  { %v96_v46 = vpop.permute.xlu1 %95 }
  0x93   :  { %v105_v48 = vmul.f32 %v96_v46, %v754_v22 }
  0x94   :  { %v156_v49 = vpop.permute.xlu2 %155 }
  0x95   :  { %v186_v50 = vmul.f32 %v156_v49, %v784_v47  ;;  %v832_v49 = vld [vmem:[#allocation2 + $0x21] sm:$0x3f] }
  0x96   :  { %319 = vperm.xlu2 %590, %v716_v11   ;;  %315 = vperm.xlu1 %592, %v708_v5  }
  0x97   :  { %v194_v51 = vadd.f32 %v186_v50, %v146_v34  ;;  %419 = vperm.xlu0 %597, %v723_v15  }
  0x99   :  { %v112_v53 = vpop.permute.xlu0 %111 }
  0x9a   :  { %v139_v54 = vmul.f32 %v112_v53, %v770_v29 }
  0x9b   :  { %v116_v55 = vpop.permute.xlu1 %115 }
  0x9c   :  { %v140_v57 = vmul.f32 %v116_v55, %v770_v29  ;;  %v147_v58 = vadd.f32 %v139_v54, %v99_v52  ;;  %v168_v59 = vpop.permute.xlu2 %167 }
  0x9d   :  { %v189_v60 = vmul.f32 %v168_v59, %v784_v47 }
  0x9e   :  { %v148_v61 = vadd.f32 %v140_v57, %v100_v56  ;;  %593 = vset.pattern.permute.xlu2 %v680_v28  ;;  %327 = vperm.xlu1 %592, %v725_v16  }
  0x9f   :  { %v197_v62 = vadd.f32 %v189_v60, %v149_v42  ;;  %600 = vset.pattern.permute.xlu0 %v682_v63  ;;  %347 = vperm.xlu2 %593, %v705_v2  }
  0xa0   :  { %447 = vperm.xlu0 %600, %v714_v10  }
  0xa1   :  { %v132_v1 = vpop.permute.xlu0 %131 }
  0xa2   :  { %v144_v3 = vmul.f32 %v132_v1, %v770_v29 }
  0xa3   :  { %v124_v4 = vpop.permute.xlu1 %123 }
  0xa4   :  { %v142_v7 = vmul.f32 %v124_v4, %v770_v29  ;;  %v152_v8 = vadd.f32 %v144_v3, %v104_v0  ;;  %v176_v9 = vpop.permute.xlu2 %175 }
  0xa5   :  { %v191_v13 = vmul.f32 %v176_v9, %v784_v47 }
  0xa6   :  { %v150_v14 = vadd.f32 %v142_v7, %v757_v24  ;;  %595 = vset.pattern.permute.xlu1 %v680_v28 }
  0xa7   :  { %v199_v17 = vadd.f32 %v191_v13, %v151_v44  ;;  %359 = vperm.xlu2 %593, %v718_v12   ;;  %355 = vperm.xlu1 %595, %v710_v6  }
  0xa8   :  { %467 = vperm.xlu0 %600, %v723_v15  }
  0xaa   :  { %v160_v10 = vpop.permute.xlu0 %159 }
  0xab   :  { %v136_v18 = vpop.permute.xlu1 %135  ;;  %v187_v19 = vmul.f32 %v160_v10, %v784_v47  ;;  %v47_v10 = vld [vmem:[#allocation2 + $0x29] sm:$0x3f] }
  0xac   :  { %v145_v21 = vmul.f32 %v136_v18, %v770_v29 }
  0xad   :  { %v195_v22 = vadd.f32 %v187_v19, %v147_v58  ;;  %v204_v23 = vpop.permute.xlu2 %203 }
  0xae   :  { %v153_v24 = vadd.f32 %v145_v21, %v105_v48  ;;  %v234_v25 = vmul.f32 %v204_v23, %v811_v20 }
  0xaf   :  { %367 = vperm.xlu2 %593, %v716_v11   ;;  %363 = vperm.xlu1 %595, %v708_v5  }
  0xb0   :  { %v242_v26 = vadd.f32 %v234_v25, %v194_v51 }
  0xb2   :  { %v180_v27 = vpop.permute.xlu0 %179 }
  0xb3   :  { %v192_v15 = vmul.f32 %v180_v27, %v784_v47 }
  0xb4   :  { %v164_v28 = vpop.permute.xlu1 %163 }
  0xb5   :  { %v200_v30 = vadd.f32 %v192_v15, %v152_v8  ;;  %v188_v31 = vmul.f32 %v164_v28, %v784_v47  ;;  %v216_v32 = vpop.permute.xlu2 %215 }
  0xb6   :  { %v237_v29 = vmul.f32 %v216_v32, %v811_v20 }
  0xb7   :  { %v196_v33 = vadd.f32 %v188_v31, %v148_v61  ;;  %596 = vset.pattern.permute.xlu2 %v681_v43  ;;  %375 = vperm.xlu1 %595, %v725_v16  }
  0xb8   :  { %v245_v34 = vadd.f32 %v237_v29, %v197_v62  ;;  %395 = vperm.xlu2 %596, %v705_v2  }
  0xbb   :  { %v208_v35 = vpop.permute.xlu0 %207 }
  0xbc   :  { %v235_v36 = vmul.f32 %v208_v35, %v811_v20  ;;  %v172_v37 = vpop.permute.xlu1 %171 }
  0xbd   :  { %v190_v38 = vmul.f32 %v172_v37, %v784_v47  ;;  %v224_v39 = vpop.permute.xlu2 %223 }
  0xbe   :  { %v825_v40 = vadd.f32 %v235_v36, %v195_v22  ;;  %v239_v41 = vmul.f32 %v224_v39, %v811_v20 }
  0xbf   :  { %v198_v42 = vadd.f32 %v190_v38, %v150_v14  ;;  %598 = vset.pattern.permute.xlu1 %v681_v43 }
  0xc0   :  { %v247_v44 = vadd.f32 %v239_v41, %v199_v17  ;;  %407 = vperm.xlu2 %596, %v718_v12   ;;  %403 = vperm.xlu1 %598, %v710_v6  }
  0xc3   :  { %v228_v45 = vpop.permute.xlu0 %227 }
  0xc4   :  { %v240_v46 = vmul.f32 %v228_v45, %v811_v20  ;;  %v184_v48 = vpop.permute.xlu1 %183 }
  0xc5   :  { %v193_v50 = vmul.f32 %v184_v48, %v784_v47 }
  0xc6   :  { %v248_v51 = vadd.f32 %v240_v46, %v200_v30  ;;  %v252_v52 = vpop.permute.xlu2 %251 }
  0xc7   :  { %v201_v53 = vadd.f32 %v193_v50, %v153_v24  ;;  %v282_v54 = vmul.f32 %v252_v52, %v832_v49 }
  0xc8   :  { %415 = vperm.xlu2 %596, %v716_v11   ;;  %411 = vperm.xlu1 %598, %v708_v5  }
  0xc9   :  { %v290_v43 = vadd.f32 %v282_v54, %v242_v26 }
  0xcc   :  { %v256_v55 = vpop.permute.xlu0 %255 }
  0xcd   :  { %v212_v56 = vpop.permute.xlu1 %211  ;;  %v283_v41 = vmul.f32 %v256_v55, %v832_v49 }
  0xce   :  { %v236_v57 = vmul.f32 %v212_v56, %v811_v20  ;;  %v264_v58 = vpop.permute.xlu2 %263 }
  0xcf   :  { %v285_v59 = vmul.f32 %v264_v58, %v832_v49 }
  0xd0   :  { %v244_v60 = vadd.f32 %v236_v57, %v196_v33  ;;  %599 = vset.pattern.permute.xlu2 %v682_v63  ;;  %423 = vperm.xlu1 %598, %v725_v16  }
  0xd1   :  { %v293_v47 = vadd.f32 %v285_v59, %v245_v34  ;;  %443 = vperm.xlu2 %599, %v705_v2  }
  0xd4   :  { %v276_v61 = vpop.permute.xlu0 %275 }
  0xd5   :  { %v288_v62 = vmul.f32 %v276_v61, %v832_v49  ;;  %v220_v0 = vpop.permute.xlu1 %219 }
  0xd6   :  { %v238_v1 = vmul.f32 %v220_v0, %v811_v20  ;;  %v272_v3 = vpop.permute.xlu2 %271 }
  0xd7   :  { %v296_v4 = vadd.f32 %v288_v62, %v248_v51  ;;  %v287_v7 = vmul.f32 %v272_v3, %v832_v49  ;;  %v867_v51 = vld [vmem:[#allocation2 + $0x39] sm:$0x3f] }
  0xd8   :  { %v246_v8 = vadd.f32 %v238_v1, %v198_v42  ;;  %601 = vset.pattern.permute.xlu1 %v682_v63  ;;  %v865_v42 = vld [vmem:[#allocation2 + $0x31] sm:$0x3f] }
  0xd9   :  { %v295_v9 = vadd.f32 %v287_v7, %v247_v44  ;;  %455 = vperm.xlu2 %599, %v718_v12   ;;  %451 = vperm.xlu1 %601, %v710_v6  }
  0xdd   :  { %v232_v13 = vpop.permute.xlu1 %231 }
  0xde   :  { %v241_v2 = vmul.f32 %v232_v13, %v811_v20  ;;  %v304_v14 = vpop.permute.xlu0 %303 }
  0xdf   :  { %v331_v45 = vmul.f32 %v304_v14, %v47_v10 }
  0xe0   :  { %v249_v17 = vadd.f32 %v241_v2, %v201_v53  ;;  %v300_v18 = vpop.permute.xlu2 %299  ;;  %v291_v53 = vadd.f32 %v283_v41, %v825_v40 }
  0xe1   :  { %v330_v19 = vmul.f32 %v300_v18, %v47_v10  ;;  %463 = vperm.xlu2 %599, %v716_v11   ;;  %459 = vperm.xlu1 %601, %v708_v5  }
  0xe2   :  { %v339_v57 = vadd.f32 %v331_v45, %v291_v53 }
  0xe3   :  { %v852_v21 = vadd.f32 %v330_v19, %v290_v43 }
  0xe6   :  { %v324_v63 = vpop.permute.xlu0 %323 }
  0xe7   :  { %v336_v22 = vmul.f32 %v324_v63, %v47_v10  ;;  %v260_v23 = vpop.permute.xlu1 %259 }
  0xe8   :  { %v284_v12 = vmul.f32 %v260_v23, %v832_v49  ;;  %v312_v6 = vpop.permute.xlu2 %311 }
  0xe9   :  { %v855_v24 = vadd.f32 %v336_v22, %v296_v4  ;;  %v333_v20 = vmul.f32 %v312_v6, %v47_v10  ;;  %471 = vperm.xlu1 %601, %v725_v16  }
  0xea   :  { %v292_v25 = vadd.f32 %v284_v12, %v244_v60 }
  0xeb   :  { %v858_v26 = vadd.f32 %v333_v20, %v293_v47 }
  0xef   :  { %v268_v27 = vpop.permute.xlu1 %267  ;;  %v352_v11 = vpop.permute.xlu0 %351 }
  0xf0   :  { %v286_v5 = vmul.f32 %v268_v27, %v832_v49  ;;  %v320_v15 = vpop.permute.xlu2 %319  ;;  %v379_v54 = vmul.f32 %v352_v11, %v865_v42 }
  0xf1   :  { %v335_v28 = vmul.f32 %v320_v15, %v47_v10 }
  0xf2   :  { %v294_v30 = vadd.f32 %v286_v5, %v246_v8  ;;  %v387_v55 = vadd.f32 %v379_v54, %v339_v57 }
  0xf3   :  { %v343_v31 = vadd.f32 %v335_v28, %v295_v9 }
  0xf7   :  { %v280_v32 = vpop.permute.xlu1 %279  ;;  %v372_v29 = vpop.permute.xlu0 %371 }
  0xf8   :  { %v289_v33 = vmul.f32 %v280_v32, %v832_v49  ;;  %v384_v12 = vmul.f32 %v372_v29, %v865_v42 }
  0xf9   :  { %v348_v34 = vpop.permute.xlu2 %347 }
  0xfa   :  { %v297_v35 = vadd.f32 %v289_v33, %v249_v17  ;;  %v378_v14 = vmul.f32 %v348_v34, %v865_v42  ;;  %v392_v15 = vadd.f32 %v384_v12, %v855_v24 }
  0xfc   :  { %v386_v18 = vadd.f32 %v378_v14, %v852_v21 }
 0x100   :  { %v308_v36 = vpop.permute.xlu1 %307 }
 0x101   :  { %v332_v37 = vmul.f32 %v308_v36, %v47_v10  ;;  %v400_v16 = vpop.permute.xlu0 %399  ;;  %v360_v38 = vpop.permute.xlu2 %359 }
 0x102   :  { %v427_v49 = vmul.f32 %v400_v16, %v867_v51  ;;  %v381_v6 = vmul.f32 %v360_v38, %v865_v42 }
 0x103   :  { %v862_v39 = vadd.f32 %v332_v37, %v292_v25 }
 0x104   :  { %v435_v60 = vadd.f32 %v427_v49, %v387_v55  ;;  %v389_v21 = vadd.f32 %v381_v6, %v858_v26 }
 0x108   :  { %v316_v44 = vpop.permute.xlu1 %315 }
 0x109   :  { %v334_v46 = vmul.f32 %v316_v44, %v47_v10  ;;  %v420_v48 = vpop.permute.xlu0 %419  ;;  %v368_v50 = vpop.permute.xlu2 %367 }
 0x10a   :  { %v383_v52 = vmul.f32 %v368_v50, %v865_v42  ;;  %v432_v27 = vmul.f32 %v420_v48, %v867_v51 }
 0x10b   :  { %v342_v43 = vadd.f32 %v334_v46, %v294_v30 }
 0x10c   :  { %v872_v56 = vadd.f32 %v383_v52, %v343_v31  ;;  %v440_v30 = vadd.f32 %v432_v27, %v392_v15 }
 0x110   :  { %v328_v58 = vpop.permute.xlu1 %327 }
 0x111   :  { %v337_v59 = vmul.f32 %v328_v58, %v47_v10 }
 0x112   :  { %v448_v47 = vpop.permute.xlu0 %447  ;;  %v396_v61 = vpop.permute.xlu2 %395 }
 0x113   :  { %v345_v62 = vadd.f32 %v337_v59, %v297_v35  ;;  %v475_v0 = vadd.f32 %v448_v47, %v435_v60  ;;  %v426_v10 = vmul.f32 %v396_v61, %v867_v51 }
 0x115   :  { %v483_v1 = vmul.f32 0.5, %v475_v0  ;;  %v434_v22 = vadd.f32 %v426_v10, %v386_v18 }
 0x117   :  { %602 = vtanh.f32 %v483_v1 }
 0x119   :  { %v356_v3 = vpop.permute.xlu1 %355 }
 0x11a   :  { %v408_v40 = vpop.permute.xlu2 %407  ;;  %v468_v28 = vpop.permute.xlu0 %467  ;;  %v380_v48 = vmul.f32 %v356_v3, %v865_v42 }
 0x11b   :  { %v429_v11 = vmul.f32 %v408_v40, %v867_v51  ;;  %v480_v29 = vadd.f32 %v468_v28, %v440_v30 }
 0x11c   :  { %v388_v54 = vadd.f32 %v380_v48, %v862_v39 }
 0x11d   :  { %v603_v4 = vpop.eup %602  ;;  %v437_v32 = vadd.f32 %v429_v11, %v389_v21  ;;  %v488_v16 = vmul.f32 0.5, %v480_v29 }
 0x11e   :  { %v499_v7 = vmul.f32 %v603_v4, %v483_v1 }
 0x120   :  { %v507_v8 = vadd.f32 %v499_v7, %v483_v1 }
 0x121   :  { %v364_v9 = vpop.permute.xlu1 %363 }
 0x122   :  { %v382_v13 = vmul.f32 %v364_v9, %v865_v42  ;;  %524 = vrot.lane.b32.xlu0 %v507_v8, %s683_s0  ;;  %v416_v2 = vpop.permute.xlu2 %415 }
 0x123   :  { %v431_v52 = vmul.f32 %v416_v2, %v867_v51 }
 0x124   :  { %v390_v17 = vadd.f32 %v382_v13, %v342_v43 }
 0x125   :  { %v439_v49 = vadd.f32 %v431_v52, %v872_v56 }
 0x129   :  { %v376_v19 = vpop.permute.xlu1 %375 }
 0x12a   :  { %v385_v63 = vmul.f32 %v376_v19, %v865_v42 }
 0x12b   :  { %v444_v23 = vpop.permute.xlu2 %443 }
 0x12c   :  { %v393_v20 = vadd.f32 %v385_v63, %v345_v62  ;;  %v474_v25 = vadd.f32 %v444_v23, %v434_v22 }
 0x12e   :  { %v482_v5 = vmul.f32 0.5, %v474_v25 }
 0x130   :  { %604 = vtanh.f32 %v482_v5 }
 0x132   :  { %v404_v31 = vpop.permute.xlu1 %403 }
 0x133   :  { %v456_v33 = vpop.permute.xlu2 %455  ;;  %v428_v53 = vmul.f32 %v404_v31, %v867_v51 }
 0x134   :  { %v477_v34 = vadd.f32 %v456_v33, %v437_v32 }
 0x135   :  { %v436_v55 = vadd.f32 %v428_v53, %v388_v54 }
 0x136   :  { %v605_v35 = vpop.eup %604  ;;  %v485_v36 = vmul.f32 0.5, %v477_v34 }
 0x137   :  { %v498_v37 = vmul.f32 %v605_v35, %v482_v5 }
 0x138   :  { %606 = vtanh.f32 %v485_v36 }
 0x139   :  { %v506_v38 = vadd.f32 %v498_v37, %v482_v5  ;;  %608 = vtanh.f32 %v488_v16 }
 0x13a   :  { %v412_v41 = vpop.permute.xlu1 %411 }
 0x13b   :  { %522 = vrot.lane.b32.xlu2 %v506_v38, %s683_s0  ;;  %v464_v43 = vpop.permute.xlu2 %463  ;;  %v430_v47 = vmul.f32 %v412_v41, %v867_v51 }
 0x13c   :  { %v479_v59 = vadd.f32 %v464_v43, %v439_v49 }
 0x13d   :  { %v438_v62 = vadd.f32 %v430_v47, %v390_v17 }
 0x13e   :  { %v607_v24 = vpop.eup %606  ;;  %v487_v61 = vmul.f32 0.5, %v479_v59 }
 0x13f   :  { %v501_v26 = vmul.f32 %v607_v24, %v485_v36  ;;  %v609_v45 = vpop.eup %608 }
 0x140   :  { %v504_v50 = vmul.f32 %v609_v45, %v488_v16 }
 0x141   :  { %v509_v44 = vadd.f32 %v501_v26, %v485_v36 }
 0x142   :  { %v424_v46 = vpop.permute.xlu1 %423  ;;  %v512_v57 = vadd.f32 %v504_v50, %v488_v16 }
 0x143   :  { %528 = vrot.lane.b32.xlu2 %v509_v44, %s683_s0  ;;  %v433_v3 = vmul.f32 %v424_v46, %v867_v51 }
 0x145   :  { %v441_v8 = vadd.f32 %v433_v3, %v393_v20 }
 0x14b   :  { %v452_v58 = vpop.permute.xlu1 %451  ;;  %534 = vrot.lane.b32.xlu2 %v512_v57, %s683_s0 }
 0x14c   :  { %v476_v60 = vadd.f32 %v452_v58, %v436_v55 }
 0x14e   :  { %v484_v42 = vmul.f32 0.5, %v476_v60 }
 0x150   :  { %610 = vtanh.f32 %v484_v42 }
 0x151   :  { %612 = vtanh.f32 %v487_v61 }
 0x153   :  { %v460_v0 = vpop.permute.xlu1 %459 }
 0x154   :  { %v478_v1 = vadd.f32 %v460_v0, %v438_v62 }
 0x156   :  { %v611_v39 = vpop.eup %610  ;;  %v486_v40 = vmul.f32 0.5, %v478_v1 }
 0x157   :  { %v500_v56 = vmul.f32 %v611_v39, %v484_v42  ;;  %v613_v7 = vpop.eup %612 }
 0x158   :  { %614 = vtanh.f32 %v486_v40  ;;  %v503_v2 = vmul.f32 %v613_v7, %v487_v61 }
 0x159   :  { %v508_v4 = vadd.f32 %v500_v56, %v484_v42 }
 0x15a   :  { %v511_v18 = vadd.f32 %v503_v2, %v487_v61 }
 0x15b   :  { %526 = vrot.lane.b32.xlu1 %v508_v4, %s683_s0  ;;  %v472_v9 = vpop.permute.xlu1 %471 }
 0x15c   :  { %v481_v13 = vadd.f32 %v472_v9, %v441_v8 }
 0x15e   :  { %v615_v14 = vpop.eup %614  ;;  %v489_v10 = vmul.f32 0.5, %v481_v13 }
 0x15f   :  { %v502_v17 = vmul.f32 %v615_v14, %v486_v40 }
 0x160   :  { %616 = vtanh.f32 %v489_v10 }
 0x161   :  { %v510_v19 = vadd.f32 %v502_v17, %v486_v40 }
 0x163   :  { %532 = vrot.lane.b32.xlu1 %v511_v18, %s683_s0  ;;  %530 = vrot.lane.b32.xlu0 %v510_v19, %s683_s0 }
 0x166   :  { %v617_v51 = vpop.eup %616 }
 0x167   :  { %v505_v63 = vmul.f32 %v617_v51, %v489_v10 }
 0x169   :  { %v513_v22 = vadd.f32 %v505_v63, %v489_v10 }
 0x16b   :  { %536 = vrot.lane.b32.xlu0 %v513_v22, %s683_s0 }
 0x194   :  { %v525_v23 = vpop.permute.xlu0 %524 }
 0x195   :  { %548 = vst.msk [vmem:[%s935_s2 + $0x8] sm:$0x3f] %vm546_vm0, %v525_v23  ;;  %v523_v12 = vpop.permute.xlu2 %522 }
 0x196   :  { %547 = vst.msk [vmem:[%s935_s2] sm:$0x3f] %vm546_vm0, %v523_v12 }
 0x19d   :  { %v529_v6 = vpop.permute.xlu2 %528 }
 0x19e   :  { %550 = vst.msk [vmem:[%s935_s2 + $0x18] sm:$0x3f] %vm546_vm0, %v529_v6 }
 0x1a5   :  { %v535_v20 = vpop.permute.xlu2 %534 }
 0x1a6   :  { %553 = vst.msk [vmem:[%s935_s2 + $0x30] sm:$0x3f] %vm546_vm0, %v535_v20 }
 0x1cd   :  { %v527_v25 = vpop.permute.xlu1 %526 }
 0x1ce   :  { %549 = vst.msk [vmem:[%s935_s2 + $0x10] sm:$0x3f] %vm546_vm0, %v527_v25 }
 0x1d5   :  { %v533_v27 = vpop.permute.xlu1 %532  ;;  %v531_v11 = vpop.permute.xlu0 %530 }
 0x1d6   :  { %552 = vst.msk [vmem:[%s935_s2 + $0x28] sm:$0x3f] %vm546_vm0, %v533_v27 }
 0x1d7   :  { %551 = vst.msk [vmem:[%s935_s2 + $0x20] sm:$0x3f] %vm546_vm0, %v531_v11 }
 0x1dd   :  { %v537_v5 = vpop.permute.xlu0 %536 }
 0x1de   :  { %554 = vst.msk [vmem:[%s935_s2 + $0x38] sm:$0x3f] %vm546_vm0, %v537_v5 }
 0x1df   :  { %559 = vsyncpa [#allocation3], 1 }
 0x1e0   :  { %560 = vsyncpa [#allocation5], 1 }

</bundles_post_ra>
